<compile_context>
chip_gen: v7x
topology: tpu7x:2x2x1
jax: 0.10.0
libtpu: 0.0.40
codegen_flags: <defaults>
</compile_context>

<pallas_src>
import jax
import jax.numpy as jnp
from jax import lax
from jax.experimental import pallas as pl
from jax.experimental.pallas import tpu as pltpu


_LANE = 128


def _vmem_capacity_bytes() -> int:
    """Physical per-TensorCore VMEM; falls back to the smallest (v7x) value."""
    try:
        cap = getattr(pltpu.get_tpu_info(), "vmem_capacity_bytes", None)
        if cap:
            return int(cap)
    except Exception:
        pass
    return 64 * 1024 * 1024


def _vmem_plan():
    """Return (vmem_limit_bytes, tile_budget_bytes) derived from physical VMEM.

    limit ~= 75% of physical (48 MiB on v7x, 96 MiB on v5e/v6e) leaves
    headroom for compiler-internal scratch; the tile budget ~= 37.5% of
    physical (24 MiB / 48 MiB) covers the 4 pipelined tile buffers
    (2x double-buffered input + 2x output).
    """
    cap = _vmem_capacity_bytes()
    vmem_limit = min((cap * 3) // 4, 100 * 1024 * 1024)
    tile_budget = (cap * 3) // 8
    return vmem_limit, tile_budget


def _pick_chunk(D: int, itemsize: int) -> int:
    """Rows per in-kernel transpose slice.

    Bounds the (chunk, D) input slice to ~32 vregs so the XLU transpose is
    fed straight from registers (no VMEM staging temp).
    """
    pack = max(1, 4 // max(itemsize, 1))        # values packed per 32-bit word
    lane_groups = pl.cdiv(max(D, 1), _LANE)     # lane tiles spanned by D
    chunk = (32 * 8 * pack) // lane_groups
    chunk = max(_LANE, (chunk // _LANE) * _LANE)
    return min(chunk, 1024)


def _plan_tile_m(M: int, D: int, itemsize: int, tile_budget: int, chunk: int) -> int:
    """Pick the fused-axis (H*W) tile size."""
    bytes_per_row = max(D * itemsize, 1)
    cap = tile_budget // (4 * bytes_per_row)        # 2x in + 2x out buffers
    cap = max(chunk, (cap // chunk) * chunk)
    if M > cap:
        return cap                                  # budget-bound; >= 2 grid steps
    # Whole fused axis fits in one tile.  For large M still split into ~8
    # steps so v7x's two TensorCores (the "parallel" grid axis) both get
    # work, but never below 2048 lanes per step.
    if M >= 8 * 2048:
        t = max(2048, pl.cdiv(M, 8))
        t = ((t + chunk - 1) // chunk) * chunk
        return min(t, cap)
    return M                                        # full extent: always legal


def _make_transpose_kernel(tile_m: int, chunk: int):
    """Kernel transposing a (tile_m, D) input block into a (D, tile_m) block."""
    n_full = tile_m // chunk
    rem = tile_m % chunk

    if n_full <= 1:
        # Small tile: a single vreg-resident transpose is fine.
        def kernel(x_ref, o_ref):
            o_ref[...] = x_ref[...].T
        return kernel

    unroll = True if n_full <= 8 else 8

    def kernel(x_ref, o_ref):
        def body(j, carry):
            base = pl.multiple_of(j * chunk, chunk)
            o_ref[:, pl.ds(base, chunk)] = x_ref[pl.ds(base, chunk), :].T
            return carry

        lax.fori_loop(0, n_full, body, 0, unroll=unroll)

        if rem:  # static tail inside the tile (only when tile_m == full M)
            o_ref[:, pl.ds(n_full * chunk, rem)] = (
                x_ref[pl.ds(n_full * chunk, rem), :].T)

    return kernel


def permute_in(x: jax.Array, dim: int, *, tile_m=None) -> jax.Array:
    """JAX/Pallas equivalent of permute_in(dim).forward(x).

    Args:
      x: array of shape (H, W, dim).
      dim: channel dimension (must equal x.shape[2]).
      tile_m: optional override for the fused H*W tile size (must be a
        multiple of 128, or equal to H*W).

    Returns:
      Array of shape (1, 1, dim, H, W), same dtype as x.
    """
    H, W, D = x.shape
    assert D == dim, f"dim mismatch: module dim={dim} but x.shape[2]={D}"

    M = H * W
    itemsize = jnp.dtype(x.dtype).itemsize
    vmem_limit, tile_budget = _vmem_plan()
    chunk = _pick_chunk(D, itemsize)

    if tile_m is None:
        tM = _plan_tile_m(M, D, itemsize, tile_budget, chunk)
    else:
        assert tile_m == M or tile_m % _LANE == 0, (
            f"tile_m must be a multiple of 128 (or equal to H*W); got {tile_m}")
        tM = min(tile_m, M)

    # Free, contiguous reshape: (H, W, D) -> (M, D).  The kernel then does a
    # plain 2-D transpose to (D, M); element (d, h*W + w) == x[h, w, d],
    # which is exactly permute(2, 0, 1) once reshaped back to (D, H, W).
    x2 = x.reshape(M, D)

    out2d = pl.pallas_call(
        _make_transpose_kernel(tM, chunk),
        out_shape=jax.ShapeDtypeStruct((D, M), x.dtype),
        grid=(pl.cdiv(M, tM),),
        in_specs=[pl.BlockSpec((tM, D), lambda i: (i, 0))],
        out_specs=pl.BlockSpec((D, tM), lambda i: (0, i)),
        compiler_params=pltpu.CompilerParams(
            dimension_semantics=("parallel",),   # v7x: shard tiles over 2 TCs
            vmem_limit_bytes=vmem_limit,
        ),
        cost_estimate=pl.CostEstimate(
            flops=0,
            transcendentals=0,
            bytes_accessed=2 * M * D * itemsize,
        ),
    )(x2)

    # The `.view(1, 1, dim, H, W)` part: pure reshape glue, no data movement.
    return out2d.reshape(1, 1, D, H, W)


def permute_in_ref(x: jax.Array) -> jax.Array:
    """Pure-JAX reference matching the PyTorch module exactly."""
    D = x.shape[2]
    xp = jnp.transpose(x, (2, 0, 1))
    return xp.reshape(1, 1, D, xp.shape[1], xp.shape[2])


if __name__ == "__main__":
    key = jax.random.PRNGKey(0)

    # Case 1: small shape consistent with the module (single tile, full .T).
    H, W, dim = 16, 16, 8
    x = jax.random.normal(key, (H, W, dim), dtype=jnp.float32)
    out = jax.block_until_ready(permute_in(x, dim))
    ref = permute_in_ref(x)
    assert out.shape == (1, 1, dim, H, W), out.shape
    assert out.dtype == x.dtype
    assert jnp.array_equal(out, ref), "Pallas output mismatch vs reference (case 1)"

    # Case 2: force the multi-step pipelined path + chunked in-kernel transpose
    # (M = 4096, tile_m = 1024 -> 4 grid steps, 4 chunks of 256 per step).
    H2, W2, dim2 = 64, 64, 8
    x2 = jax.random.normal(jax.random.PRNGKey(0), (H2, W2, dim2), dtype=jnp.float32)
    out2 = jax.block_until_ready(permute_in(x2, dim2, tile_m=1024))
    ref2 = permute_in_ref(x2)
    assert out2.shape == (1, 1, dim2, H2, W2), out2.shape
    assert jnp.array_equal(out2, ref2), "Pallas output mismatch vs reference (case 2)"

    # Case 3: default auto-tiling on a bf16 input (exercises the chunked loop
    # chosen by the planner with a packed dtype).
    H3, W3, dim3 = 48, 32, 16
    x3 = jax.random.normal(jax.random.PRNGKey(0), (H3, W3, dim3),
                           dtype=jnp.bfloat16)
    out3 = jax.block_until_ready(permute_in(x3, dim3))
    ref3 = permute_in_ref(x3)
    assert out3.shape == (1, 1, dim3, H3, W3), out3.shape
    assert out3.dtype == x3.dtype
    assert jnp.array_equal(out3, ref3), "Pallas output mismatch vs reference (case 3)"

    print("KERNEL_OK")
</pallas_src>

<mosaic_0001>
module attributes {stable_mosaic.version = 11 : i64} {
  func.func @kernel(%arg0: i32, %arg1: memref<256x8xf32, #tpu.memory_space<vmem>>, %arg2: memref<8x256xf32, #tpu.memory_space<vmem>>) attributes {dimension_semantics = [#tpu.dimension_semantics<parallel>], iteration_bounds = array<i64: 1>, scalar_prefetch = 0 : i64, scratch_operands = 0 : i64, tpu.core_type = #tpu.core_type<tc>, window_params = [{transform_indices = @transform_0, window_bounds = array<i64: 256, 8>}, {transform_indices = @transform_1, window_bounds = array<i64: 8, 256>}]} {
    %c0 = arith.constant 0 : index
    %c0_0 = arith.constant 0 : index
    %0 = vector.load %arg1[%c0, %c0_0] : memref<256x8xf32, #tpu.memory_space<vmem>>, vector<256x8xf32>
    %1 = tpu.transpose %0, [1, 0] : vector<256x8xf32> -> vector<8x256xf32>
    %c0_1 = arith.constant 0 : index
    %c0_2 = arith.constant 0 : index
    %2 = vector.load %arg2[%c0_1, %c0_2] : memref<8x256xf32, #tpu.memory_space<vmem>>, vector<8x256xf32>
    tpu.vector_store %arg2[%c0_1, %c0_2], %1 {strides = array<i32>} : memref<8x256xf32, #tpu.memory_space<vmem>>, vector<8x256xf32>,
    return
  }
  func.func @transform_0(%arg0: i32) -> (i32, i32) {
    %c0_i32 = arith.constant 0 : i32
    %c0_i32_0 = arith.constant 0 : i32
    return %arg0, %c0_i32 : i32, i32
  }
  func.func @transform_1(%arg0: i32) -> (i32, i32) {
    %c0_i32 = arith.constant 0 : i32
    %c0_i32_0 = arith.constant 0 : i32
    return %c0_i32, %arg0 : i32, i32
  }
}

</mosaic_0001>

<bundles_post_ra>
// kernel: tpu_custom_call.1
= control target key start
LH: loop header
LB: loop body
LE: loop exit
PB: predicated region body
PF: predicated region fallthrough
CT: control target
= control target key end

     0   :  { %s265_s0 = inlined_call_operand.vmem [shape: f32[256,8], index: 0, kind: input, shape index: {}]   ;;  %s266_s1 = inlined_call_operand.hbm [shape: f32[8,256], index: 1, kind: output, shape index: {}]  }
   0x1   :  { %v25_v0 = vld [vmem:[%s265_s0 + $0x80] sm:$0xff]  ;;  %v26_v2 = vld [vmem:[%s265_s0 + $0x88] sm:$0xff]  ;;  %v27_v4 = vld [vmem:[%s265_s0 + $0x90] sm:$0xff] }
   0x2   :  { %v9_v1 = vld [vmem:[%s265_s0] sm:$0xff]  ;;  %73 = vxpose.xlu1.b32.start [1/16] (narrow) %v25_v0, 8  ;;  %v10_v3 = vld [vmem:[%s265_s0 + $0x8] sm:$0xff]  ;;  %v11_v5 = vld [vmem:[%s265_s0 + $0x10] sm:$0xff] }
   0x3   :  { %41 = vxpose.xlu0.b32.start [1/16] (narrow) %v9_v1, 8  ;;  %v28_v6 = vld [vmem:[%s265_s0 + $0x98] sm:$0xff] }
   0x4   :  { %v12_v7 = vld [vmem:[%s265_s0 + $0x18] sm:$0xff] }
   0x6   :  { %74 = vxpose.xlu1.b32.cont [2/16] (narrow) %v26_v2, 8 }
   0x7   :  { %42 = vxpose.xlu0.b32.cont [2/16] (narrow) %v10_v3, 8 }
   0xa   :  { %75 = vxpose.xlu1.b32.cont [3/16] (narrow) %v27_v4, 8 }
   0xb   :  { %43 = vxpose.xlu0.b32.cont [3/16] (narrow) %v11_v5, 8 }
   0xc   :  { %6 = vsyncpa [#allocation3], 0  ;;  %v29_v8 = vld [vmem:[%s265_s0 + $0xa0] sm:$0xff]  ;;  %v30_v10 = vld [vmem:[%s265_s0 + $0xa8] sm:$0xff]  ;;  %s146_s12 = smov [#allocation2]  }
   0xd   :  { %v13_v9 = vld [vmem:[%s265_s0 + $0x20] sm:$0xff]  ;;  %v14_v11 = vld [vmem:[%s265_s0 + $0x28] sm:$0xff]  ;;  %v31_v12 = vld [vmem:[%s265_s0 + $0xb0] sm:$0xff]  ;;  %s113_s13 = sshll.u32 %s146_s12, 4  ;;  %s114_s13 = int_to_ptr.vmem [resolvable:$true] %s113_s13 }
   0xe   :  { %76 = vxpose.xlu1.b32.cont [4/16] (narrow) %v28_v6, 8  ;;  %v15_v13 = vld [vmem:[%s265_s0 + $0x30] sm:$0xff]  ;;  %v32_v14 = vld [vmem:[%s265_s0 + $0xb8] sm:$0xff]  ;;  %v33_v16 = vld [vmem:[%s265_s0 + $0xc0] sm:$0xff]  ;;  %s122_s14 = scalar_lea.vmem %s114_s13, 256  ;;  %p127_p1 = scmp.lt.s32.totalorder %s114_s13, %s114_s13 }
   0xf   :  { %44 = vxpose.xlu0.b32.cont [4/16] (narrow) %v12_v7, 8  ;;  %v16_v15 = vld [vmem:[%s265_s0 + $0x38] sm:$0xff]  ;;  %v17_v17 = vld [vmem:[%s265_s0 + $0x40] sm:$0xff]  ;;  %v34_v18 = vld [vmem:[%s265_s0 + $0xc8] sm:$0xff]  ;;  %p123_p0 = scmp.ne.s32.totalorder %s114_s13, %s122_s14  ;;  %p128_p2 = scmp.lt.s32.totalorder %s122_s14, %s122_s14 }
  0x10   :  { %v18_v19 = vld [vmem:[%s265_s0 + $0x48] sm:$0xff]  ;;  %v35_v20 = vld [vmem:[%s265_s0 + $0xd0] sm:$0xff]  ;;  %v36_v22 = vld [vmem:[%s265_s0 + $0xd8] sm:$0xff] }
  0x11   :  { %v19_v21 = vld [vmem:[%s265_s0 + $0x50] sm:$0xff]  ;;  %v20_v23 = vld [vmem:[%s265_s0 + $0x58] sm:$0xff]  ;;  %v37_v24 = vld [vmem:[%s265_s0 + $0xe0] sm:$0xff]  ;;  %p129_p3 = por %p128_p2, %p127_p1 }
  0x12   :  { %77 = vxpose.xlu1.b32.cont [5/16] (narrow) %v29_v8, 8  ;;  %v21_v25 = vld [vmem:[%s265_s0 + $0x60] sm:$0xff]  ;;  %v38_v26 = vld [vmem:[%s265_s0 + $0xe8] sm:$0xff]  ;;  %v39_v28 = vld [vmem:[%s265_s0 + $0xf0] sm:$0xff] }
  0x13   :  { %45 = vxpose.xlu0.b32.cont [5/16] (narrow) %v13_v9, 8  ;;  %v22_v27 = vld [vmem:[%s265_s0 + $0x68] sm:$0xff]  ;;  %v23_v29 = vld [vmem:[%s265_s0 + $0x70] sm:$0xff]  ;;  %v40_v30 = vld [vmem:[%s265_s0 + $0xf8] sm:$0xff]  ;;  %p130_p4 = pnand %p129_p3, %p123_p0 }
  0x14   :  { %v24_v31 = vld [vmem:[%s265_s0 + $0x78] sm:$0xff] }
  0x16   :  { %78 = vxpose.xlu1.b32.cont [6/16] (narrow) %v30_v10, 8 }
  0x17   :  { %46 = vxpose.xlu0.b32.cont [6/16] (narrow) %v14_v11, 8 }
  0x1a   :  { %79 = vxpose.xlu1.b32.cont [7/16] (narrow) %v31_v12, 8 }
  0x1b   :  { %47 = vxpose.xlu0.b32.cont [7/16] (narrow) %v15_v13, 8 }
  0x1e   :  { %80 = vxpose.xlu1.b32.cont [8/16] (narrow) %v32_v14, 8 }
  0x1f   :  { %48 = vxpose.xlu0.b32.cont [8/16] (narrow) %v16_v15, 8 }
  0x22   :  { %81 = vxpose.xlu1.b32.cont [9/16] (narrow) %v33_v16, 8 }
  0x23   :  { %49 = vxpose.xlu0.b32.cont [9/16] (narrow) %v17_v17, 8 }
  0x26   :  { %82 = vxpose.xlu1.b32.cont [10/16] (narrow) %v34_v18, 8 }
  0x27   :  { %50 = vxpose.xlu0.b32.cont [10/16] (narrow) %v18_v19, 8 }
  0x2a   :  { %83 = vxpose.xlu1.b32.cont [11/16] (narrow) %v35_v20, 8 }
  0x2b   :  { %51 = vxpose.xlu0.b32.cont [11/16] (narrow) %v19_v21, 8 }
  0x2e   :  { %84 = vxpose.xlu1.b32.cont [12/16] (narrow) %v36_v22, 8 }
  0x2f   :  { %52 = vxpose.xlu0.b32.cont [12/16] (narrow) %v20_v23, 8 }
  0x32   :  { %85 = vxpose.xlu1.b32.cont [13/16] (narrow) %v37_v24, 8 }
  0x33   :  { %53 = vxpose.xlu0.b32.cont [13/16] (narrow) %v21_v25, 8 }
  0x36   :  { %86 = vxpose.xlu1.b32.cont [14/16] (narrow) %v38_v26, 8 }
  0x37   :  { %54 = vxpose.xlu0.b32.cont [14/16] (narrow) %v22_v27, 8 }
  0x3a   :  { %87 = vxpose.xlu1.b32.cont [15/16] (narrow) %v39_v28, 8 }
  0x3b   :  { %55 = vxpose.xlu0.b32.cont [15/16] (narrow) %v23_v29, 8 }
  0x3e   :  { %88 = vxpose.xlu1.b32.end [16/16] (narrow) %v40_v30, 8 }
  0x3f   :  { %56 = vxpose.xlu0.b32.end [16/16] (narrow) %v24_v31, 8 }
  0x82   :  { %v89_v32 = vpop.trf.xlu1 }
  0x83   :  { %v57_v33 = vpop.trf.xlu0  ;;  %106 = vst [vmem:[#allocation2 + $0x8] sm:$0xff] %v89_v32 }
  0x84   :  { %105 = vst [vmem:[#allocation2] sm:$0xff] %v57_v33 }
  0x85   :  { %133 = shalt.err (!%p130_p4)
}
  0x86   :  { %s134_s0 = scalar_lea.hbm %s266_s1, 256 }
  0x87   :  { %p135_p5 = scmp.ne.s32.totalorder %s266_s1, %s134_s0  ;;  %p138_p6 = scmp.lt.u32.totalorder %s134_s0, %s266_s1 }
  0x89   :  { %p140_p7 = pnand %p138_p6, %p135_p5 }
  0x8b   :  { %143 = shalt.err (!%p140_p7)
}
  0x8c   :  { %116 = dma.vmem_to_hbm [thread:$0]  %s114_s13, 256, %s266_s1, [#allocation3]  }
  0x8d   :  { %144 = dma.done.wait [#allocation3], 256  }
  0x8e   :  { %145 = vsyncadd [#allocation3], 4294967040 }
  0x8f   :  { %120 = vsyncpa [#allocation3], 1 }

</bundles_post_ra>
